<compile_context>
chip_gen: v5e
topology: v5e:2x2
jax: 0.10.0
libtpu: 0.0.40
codegen_flags: <defaults>
</compile_context>

<pallas_src>
import functools

import jax
import jax.numpy as jnp
import numpy as np
from jax import lax
from jax.experimental import pallas as pl
from jax.experimental.pallas import tpu as pltpu


def island_stats_kernel(emb_ref, lab_ref, sums_ref, sqsums_ref, counts_ref, *,
                        total_rows, num_classes, block_rows, tiles_per_split,
                        full_tiles, grid_tiles):
    c = pl.program_id(0)             # core-split index ("parallel" axis)
    t = pl.program_id(1)             # tile index within the split ("arbitrary" axis)
    g = c * tiles_per_split + t      # global tile index

    @pl.when(t == 0)
    def _init():
        sums_ref[...] = jnp.zeros_like(sums_ref)
        sqsums_ref[...] = jnp.zeros_like(sqsums_ref)
        counts_ref[...] = jnp.zeros_like(counts_ref)

    class_ids = lax.broadcasted_iota(jnp.int32, (block_rows, num_classes), 1)
    contract = (((0,), (0,)), ((), ()))   # onehot^T @ x

    def accumulate(emb, onehot):
        # Two matmuls with the same one-hot LHS (no concat temp); counts are a
        # sublane (XLU) reduction instead of a 128-lane ones matmul.
        # NOTE: per-step RMW of sums/sqsums is 2*K*D f32; for large K pick bigger
        # tiles (fewer steps) so it stays well below the tile's DMA volume.
        sums_ref[...] += lax.dot_general(onehot, emb, contract,
                                         preferred_element_type=jnp.float32)
        sqsums_ref[...] += lax.dot_general(onehot, emb * emb, contract,
                                           preferred_element_type=jnp.float32)
        counts_ref[...] += jnp.sum(onehot, axis=0, keepdims=True)

    if full_tiles > 0:
        @pl.when(g < full_tiles)
        def _full_tile():            # steady state: no masking work at all
            emb = emb_ref[...].astype(jnp.float32)   # cast in-kernel (no wrapper copy)
            onehot = (lab_ref[...] == class_ids).astype(jnp.float32)
            accumulate(emb, onehot)

    if grid_tiles > full_tiles:      # emitted only if a ragged / clamped tile exists
        @pl.when(g >= full_tiles)
        def _ragged_tile():          # final partial tile and any clamped OOB tile
            row = g * block_rows + lax.broadcasted_iota(jnp.int32, (block_rows, 1), 0)
            valid = row < total_rows
            emb = jnp.where(valid, emb_ref[...].astype(jnp.float32), 0.0)
            onehot = ((lab_ref[...] == class_ids) & valid).astype(jnp.float32)
            accumulate(emb, onehot)


def _round_up(x, m):
    return ((x + m - 1) // m) * m


def island_loss(embeddings, labels, num_classes, alpha=0.5, beta=0.5,
                block_rows=None, num_splits=2):
    n, d = embeddings.shape
    itemsize = jnp.dtype(embeddings.dtype).itemsize

    # Byte-targeted tile: ~2 MiB of input per tile; bound the in-kernel f32
    # temporaries (emb^2, one-hot) to ~4 MiB; rows a multiple of 8.
    if block_rows is None:
        block_rows = max(8, (2 << 20) // max(1, d * itemsize))
        while block_rows > 8 and block_rows * (d + num_classes) * 4 > (4 << 20):
            block_rows //= 2
    block_rows = int(min(block_rows, _round_up(n, 8)))
    block_rows = max(8, (block_rows // 8) * 8)

    num_tiles = pl.cdiv(n, block_rows)        # tiles that actually contain data
    full_tiles = n // block_rows              # tiles with no ragged rows
    num_splits = max(1, min(int(num_splits), num_tiles))
    tiles_per_split = pl.cdiv(num_tiles, num_splits)
    grid_tiles = num_splits * tiles_per_split  # >= num_tiles

    if grid_tiles == num_tiles:
        def in_index(c, t):
            return (c * tiles_per_split + t, 0)
    else:
        # Clamp the (at most num_splits-1) excess tiles onto the last real tile so
        # the DMA stays in bounds; the kernel masks their contribution to zero.
        def in_index(c, t):
            return (jnp.minimum(c * tiles_per_split + t, num_tiles - 1), 0)

    lab2d = labels.reshape(n, 1).astype(jnp.int32)

    kernel = functools.partial(
        island_stats_kernel,
        total_rows=n, num_classes=num_classes, block_rows=block_rows,
        tiles_per_split=tiles_per_split, full_tiles=full_tiles, grid_tiles=grid_tiles)

    # Generous scoped-VMEM budget (double-buffered tiles + resident stats + temps),
    # clamped to stay inside every generation's physical VMEM (v7x: 64 MiB / TC).
    est_vmem = (2 * block_rows * d * itemsize            # double-buffered emb tiles
                + 2 * block_rows * 128 * 4               # label tiles (lane-padded)
                + 4 * _round_up(num_classes, 8) * max(d, 128) * 4   # stat buffers
                + block_rows * (2 * d + max(num_classes, 128)) * 4  # f32 temporaries
                + (4 << 20))                             # headroom
    vmem_limit = int(min(max(est_vmem, 32 << 20), 48 << 20))

    psums, psqsums, pcounts = pl.pallas_call(
        kernel,
        out_shape=(
            jax.ShapeDtypeStruct((num_splits, num_classes, d), jnp.float32),
            jax.ShapeDtypeStruct((num_splits, num_classes, d), jnp.float32),
            jax.ShapeDtypeStruct((num_splits, 1, num_classes), jnp.float32),
        ),
        grid_spec=pltpu.PrefetchScalarGridSpec(
            num_scalar_prefetch=0,
            grid=(num_splits, tiles_per_split),
            in_specs=[
                pl.BlockSpec((block_rows, d), in_index),   # embeddings tile
                pl.BlockSpec((block_rows, 1), in_index),   # labels tile
            ],
            out_specs=[
                pl.BlockSpec((None, num_classes, d), lambda c, t: (c, 0, 0)),
                pl.BlockSpec((None, num_classes, d), lambda c, t: (c, 0, 0)),
                pl.BlockSpec((None, 1, num_classes), lambda c, t: (c, 0, 0)),
            ],
        ),
        compiler_params=pltpu.CompilerParams(
            dimension_semantics=("parallel", "arbitrary"),
            vmem_limit_bytes=vmem_limit),
    )(embeddings, lab2d)

    # --- Tiny K x D epilogue in plain JAX (combine per-split partials, form loss). ---
    sums = jnp.sum(psums, axis=0)                       # [K, D]
    sqsums = jnp.sum(psqsums, axis=0)                   # [K, D]
    counts = jnp.sum(pcounts, axis=(0, 1))              # [K]
    safe = jnp.maximum(counts, 1.0)
    means = sums / safe[:, None]                        # [K, D]

    # intra: sum_k  sum_{n in k, d} (x - m_k)^2 / (c_k * D)   for classes with c_k > 1
    sq_dev = jnp.sum(sqsums, axis=1) - counts * jnp.sum(means * means, axis=1)
    sq_dev = jnp.maximum(sq_dev, 0.0)                   # guard the f32 cancellation
    intra = jnp.sum(jnp.where(counts > 1.0, sq_dev / safe, 0.0))

    # inter: sum_{i<j} ||m_i - m_j||^2 / D from explicit pairwise mean differences
    # (numerically safer than the K*sum||m||^2 - ||sum m||^2 identity; O(K^2 D) is
    # fine for the small class counts this loss is used with).
    diff = means[:, None, :] - means[None, :, :]        # [K, K, D]
    pair = jnp.sum(diff * diff, axis=-1)                # symmetric, zero diagonal
    inter = 0.5 * jnp.sum(pair)

    return (alpha / d) * intra + (beta / d) * inter


def island_loss_reference_numpy(emb, lab, alpha=0.5, beta=0.5):
    """Direct NumPy transcription of the PyTorch forward (for verification)."""
    emb = np.asarray(emb, dtype=np.float64)
    lab = np.asarray(lab)
    uniq = np.unique(lab)
    intra = 0.0
    for u in uniq:
        ce = emb[lab == u]
        if ce.shape[0] > 1:
            m = ce.mean(axis=0)
            intra += np.mean((ce - m) ** 2)
    inter = 0.0
    K = uniq.size
    for i in range(K):
        for j in range(i + 1, K):
            mi = emb[lab == i].mean(axis=0)
            mj = emb[lab == j].mean(axis=0)
            inter += np.mean((mi - mj) ** 2)
    return alpha * intra + beta * inter


if __name__ == "__main__":
    key = jax.random.PRNGKey(0)
    k1, k2, k3 = jax.random.split(key, 3)

    K = 4
    alpha, beta = 0.5, 0.5

    # Case 1: N a multiple of the tile size -> pure unmasked steady state, 2-way
    # split, multi-step accumulation per split.
    N1, D1 = 32, 256
    emb1 = jax.random.normal(k1, (N1, D1), dtype=jnp.float32)
    lab1 = jax.random.permutation(k2, jnp.repeat(jnp.arange(K, dtype=jnp.int32), N1 // K))
    ref1 = island_loss_reference_numpy(emb1, lab1, alpha=alpha, beta=beta)
    out1 = jax.block_until_ready(island_loss(emb1, lab1, K, alpha, beta, block_rows=8))
    np.testing.assert_allclose(np.asarray(out1), ref1, rtol=1e-4, atol=1e-5)

    # Case 2: ragged N -> exercises the masked final tile and the clamped
    # out-of-range tile on the second split.
    N2, D2 = 37, 256
    emb2 = jax.random.normal(k3, (N2, D2), dtype=jnp.float32)
    lab2 = ((jnp.arange(N2, dtype=jnp.int32) * 7 + 3) % K).astype(jnp.int32)
    ref2 = island_loss_reference_numpy(emb2, lab2, alpha=alpha, beta=beta)
    out2 = jax.block_until_ready(island_loss(emb2, lab2, K, alpha, beta, block_rows=8))
    np.testing.assert_allclose(np.asarray(out2), ref2, rtol=1e-4, atol=1e-5)

    # Case 3: default byte-targeted tile -> single tile, single split.
    out3 = jax.block_until_ready(island_loss(emb1, lab1, K, alpha, beta))
    np.testing.assert_allclose(np.asarray(out3), ref1, rtol=1e-4, atol=1e-5)

    print("KERNEL_OK")
</pallas_src>

<mosaic_0001>
module attributes {stable_mosaic.version = 11 : i64} {
  func.func @island_stats_kernel(%arg0: i32, %arg1: i32, %arg2: memref<8x256xf32, #tpu.memory_space<vmem>>, %arg3: memref<8x1xi32, #tpu.memory_space<vmem>>, %arg4: memref<1x4x256xf32, #tpu.memory_space<vmem>>, %arg5: memref<1x4x256xf32, #tpu.memory_space<vmem>>, %arg6: memref<1x1x4xf32, #tpu.memory_space<vmem>>) attributes {dimension_semantics = [#tpu.dimension_semantics<parallel>, #tpu.dimension_semantics<arbitrary>], iteration_bounds = array<i64: 2, 2>, scalar_prefetch = 0 : i64, scratch_operands = 0 : i64, tpu.core_type = #tpu.core_type<tc>, window_params = [{transform_indices = @transform_0, window_bounds = array<i64: 8, 256>}, {transform_indices = @transform_1, window_bounds = array<i64: 8, 1>}, {transform_indices = @transform_2, window_bounds = array<i64: 1, 4, 256>}, {transform_indices = @transform_3, window_bounds = array<i64: 1, 4, 256>}, {transform_indices = @transform_4, window_bounds = array<i64: 1, 1, 4>}]} {
    %c2_i32 = arith.constant 2 : i32
    %0 = arith.muli %arg0, %c2_i32 : i32
    %1 = arith.addi %0, %arg1 : i32
    %c0_i32 = arith.constant 0 : i32
    %2 = arith.cmpi eq, %arg1, %c0_i32 : i32
    %3 = arith.extui %2 : i1 to i32
    %c0_i32_0 = arith.constant 0 : i32
    %4 = arith.cmpi ne, %3, %c0_i32_0 : i32
    scf.if %4 {
      %cst = arith.constant 0.000000e+00 : f32
      %9 = vector.broadcast %cst : f32 to vector<4x256xf32>
      %c0 = arith.constant 0 : index
      %c0_2 = arith.constant 0 : index
      %c0_3 = arith.constant 0 : index
      %10 = vector.load %arg4[%c0, %c0_2, %c0_3] : memref<1x4x256xf32, #tpu.memory_space<vmem>>, vector<1x4x256xf32>
      %11 = vector.shape_cast %10 : vector<1x4x256xf32> to vector<4x256xf32>
      %12 = vector.shape_cast %9 : vector<4x256xf32> to vector<1x4x256xf32>
      tpu.vector_store %arg4[%c0, %c0_2, %c0_3], %12 {strides = array<i32>} : memref<1x4x256xf32, #tpu.memory_space<vmem>>, vector<1x4x256xf32>,
      %cst_4 = arith.constant 0.000000e+00 : f32
      %13 = vector.broadcast %cst_4 : f32 to vector<4x256xf32>
      %c0_5 = arith.constant 0 : index
      %c0_6 = arith.constant 0 : index
      %c0_7 = arith.constant 0 : index
      %14 = vector.load %arg5[%c0_5, %c0_6, %c0_7] : memref<1x4x256xf32, #tpu.memory_space<vmem>>, vector<1x4x256xf32>
      %15 = vector.shape_cast %14 : vector<1x4x256xf32> to vector<4x256xf32>
      %16 = vector.shape_cast %13 : vector<4x256xf32> to vector<1x4x256xf32>
      tpu.vector_store %arg5[%c0_5, %c0_6, %c0_7], %16 {strides = array<i32>} : memref<1x4x256xf32, #tpu.memory_space<vmem>>, vector<1x4x256xf32>,
      %cst_8 = arith.constant 0.000000e+00 : f32
      %17 = vector.broadcast %cst_8 : f32 to vector<1x4xf32>
      %c0_9 = arith.constant 0 : index
      %c0_10 = arith.constant 0 : index
      %c0_11 = arith.constant 0 : index
      %18 = vector.load %arg6[%c0_9, %c0_10, %c0_11] : memref<1x1x4xf32, #tpu.memory_space<vmem>>, vector<1x1x4xf32>
      %19 = vector.shape_cast %18 : vector<1x1x4xf32> to vector<1x4xf32>
      %20 = vector.shape_cast %17 : vector<1x4xf32> to vector<1x1x4xf32>
      tpu.vector_store %arg6[%c0_9, %c0_10, %c0_11], %20 {strides = array<i32>} : memref<1x1x4xf32, #tpu.memory_space<vmem>>, vector<1x1x4xf32>,
    } else {
    }
    %5 = tpu.iota {dimensions = array<i32: 1>} : vector<8x4xi32>
    %c4_i32 = arith.constant 4 : i32
    %6 = arith.cmpi slt, %1, %c4_i32 : i32
    %7 = arith.extui %6 : i1 to i32
    %c0_i32_1 = arith.constant 0 : i32
    %8 = arith.cmpi ne, %7, %c0_i32_1 : i32
    scf.if %8 {
      %c0 = arith.constant 0 : index
      %c0_2 = arith.constant 0 : index
      %9 = vector.load %arg2[%c0, %c0_2] : memref<8x256xf32, #tpu.memory_space<vmem>>, vector<8x256xf32>
      %c0_3 = arith.constant 0 : index
      %c0_4 = arith.constant 0 : index
      %10 = vector.load %arg3[%c0_3, %c0_4] : memref<8x1xi32, #tpu.memory_space<vmem>>, vector<8x1xi32>
      %11 = vector.broadcast %10 : vector<8x1xi32> to vector<8x4xi32>
      %12 = arith.cmpi eq, %11, %5 : vector<8x4xi32>
      %13 = arith.extui %12 : vector<8x4xi1> to vector<8x4xi32>
      %14 = arith.sitofp %13 : vector<8x4xi32> to vector<8x4xf32>
      %c0_5 = arith.constant 0 : index
      %c0_6 = arith.constant 0 : index
      %c0_7 = arith.constant 0 : index
      %15 = vector.load %arg4[%c0_5, %c0_6, %c0_7] : memref<1x4x256xf32, #tpu.memory_space<vmem>>, vector<1x4x256xf32>
      %16 = vector.shape_cast %15 : vector<1x4x256xf32> to vector<4x256xf32>
      %cst = arith.constant dense<0.000000e+00> : vector<4x256xf32>
      %17 = tpu.matmul %14, %9, %cst {dimension_numbers = #tpu.dot_dimension_numbers<[0], [0], [1], [1], [0, 1, 1, 1], [], []>} : vector<8x4xf32>, vector<8x256xf32>, vector<4x256xf32> -> vector<4x256xf32>
      %18 = arith.addf %16, %17 : vector<4x256xf32>
      %c0_8 = arith.constant 0 : index
      %c0_9 = arith.constant 0 : index
      %c0_10 = arith.constant 0 : index
      %19 = vector.load %arg4[%c0_8, %c0_9, %c0_10] : memref<1x4x256xf32, #tpu.memory_space<vmem>>, vector<1x4x256xf32>
      %20 = vector.shape_cast %19 : vector<1x4x256xf32> to vector<4x256xf32>
      %21 = vector.shape_cast %18 : vector<4x256xf32> to vector<1x4x256xf32>
      tpu.vector_store %arg4[%c0_8, %c0_9, %c0_10], %21 {strides = array<i32>} : memref<1x4x256xf32, #tpu.memory_space<vmem>>, vector<1x4x256xf32>,
      %c0_11 = arith.constant 0 : index
      %c0_12 = arith.constant 0 : index
      %c0_13 = arith.constant 0 : index
      %22 = vector.load %arg5[%c0_11, %c0_12, %c0_13] : memref<1x4x256xf32, #tpu.memory_space<vmem>>, vector<1x4x256xf32>
      %23 = vector.shape_cast %22 : vector<1x4x256xf32> to vector<4x256xf32>
      %24 = arith.mulf %9, %9 : vector<8x256xf32>
      %cst_14 = arith.constant dense<0.000000e+00> : vector<4x256xf32>
      %25 = tpu.matmul %14, %24, %cst_14 {dimension_numbers = #tpu.dot_dimension_numbers<[0], [0], [1], [1], [0, 1, 1, 1], [], []>} : vector<8x4xf32>, vector<8x256xf32>, vector<4x256xf32> -> vector<4x256xf32>
      %26 = arith.addf %23, %25 : vector<4x256xf32>
      %c0_15 = arith.constant 0 : index
      %c0_16 = arith.constant 0 : index
      %c0_17 = arith.constant 0 : index
      %27 = vector.load %arg5[%c0_15, %c0_16, %c0_17] : memref<1x4x256xf32, #tpu.memory_space<vmem>>, vector<1x4x256xf32>
      %28 = vector.shape_cast %27 : vector<1x4x256xf32> to vector<4x256xf32>
      %29 = vector.shape_cast %26 : vector<4x256xf32> to vector<1x4x256xf32>
      tpu.vector_store %arg5[%c0_15, %c0_16, %c0_17], %29 {strides = array<i32>} : memref<1x4x256xf32, #tpu.memory_space<vmem>>, vector<1x4x256xf32>,
      %c0_18 = arith.constant 0 : index
      %c0_19 = arith.constant 0 : index
      %c0_20 = arith.constant 0 : index
      %30 = vector.load %arg6[%c0_18, %c0_19, %c0_20] : memref<1x1x4xf32, #tpu.memory_space<vmem>>, vector<1x1x4xf32>
      %31 = vector.shape_cast %30 : vector<1x1x4xf32> to vector<1x4xf32>
      %cst_21 = arith.constant dense<0.000000e+00> : vector<4xf32>
      %32 = vector.multi_reduction <add>, %14, %cst_21 [0] : vector<8x4xf32> to vector<4xf32>
      %33 = vector.shape_cast %32 : vector<4xf32> to vector<1x4xf32>
      %34 = arith.addf %31, %33 : vector<1x4xf32>
      %c0_22 = arith.constant 0 : index
      %c0_23 = arith.constant 0 : index
      %c0_24 = arith.constant 0 : index
      %35 = vector.load %arg6[%c0_22, %c0_23, %c0_24] : memref<1x1x4xf32, #tpu.memory_space<vmem>>, vector<1x1x4xf32>
      %36 = vector.shape_cast %35 : vector<1x1x4xf32> to vector<1x4xf32>
      %37 = vector.shape_cast %34 : vector<1x4xf32> to vector<1x1x4xf32>
      tpu.vector_store %arg6[%c0_22, %c0_23, %c0_24], %37 {strides = array<i32>} : memref<1x1x4xf32, #tpu.memory_space<vmem>>, vector<1x1x4xf32>,
    } else {
    }
    return
  }
  func.func @transform_0(%arg0: i32, %arg1: i32) -> (i32, i32) {
    %c2_i32 = arith.constant 2 : i32
    %0 = arith.muli %arg0, %c2_i32 : i32
    %1 = arith.addi %0, %arg1 : i32
    %c0_i32 = arith.constant 0 : i32
    %c0_i32_0 = arith.constant 0 : i32
    return %1, %c0_i32 : i32, i32
  }
  func.func @transform_1(%arg0: i32, %arg1: i32) -> (i32, i32) {
    %c2_i32 = arith.constant 2 : i32
    %0 = arith.muli %arg0, %c2_i32 : i32
    %1 = arith.addi %0, %arg1 : i32
    %c0_i32 = arith.constant 0 : i32
    %c0_i32_0 = arith.constant 0 : i32
    return %1, %c0_i32 : i32, i32
  }
  func.func @transform_2(%arg0: i32, %arg1: i32) -> (i32, i32, i32) {
    %c0_i32 = arith.constant 0 : i32
    %c0_i32_0 = arith.constant 0 : i32
    %c0_i32_1 = arith.constant 0 : i32
    return %arg0, %c0_i32, %c0_i32_0 : i32, i32, i32
  }
  func.func @transform_3(%arg0: i32, %arg1: i32) -> (i32, i32, i32) {
    %c0_i32 = arith.constant 0 : i32
    %c0_i32_0 = arith.constant 0 : i32
    %c0_i32_1 = arith.constant 0 : i32
    return %arg0, %c0_i32, %c0_i32_0 : i32, i32, i32
  }
  func.func @transform_4(%arg0: i32, %arg1: i32) -> (i32, i32, i32) {
    %c0_i32 = arith.constant 0 : i32
    %c0_i32_0 = arith.constant 0 : i32
    %c0_i32_1 = arith.constant 0 : i32
    return %arg0, %c0_i32, %c0_i32_0 : i32, i32, i32
  }
}

</mosaic_0001>

<bundles_post_ra>
// kernel: tpu_custom_call.1
= control target key start
LH: loop header
LB: loop body
LE: loop exit
PB: predicated region body
PF: predicated region fallthrough
CT: control target
= control target key end

     0   :  { %s1304_s0 = inlined_call_operand.hbm [shape: f32[32,256], index: 0, kind: input, shape index: {}]   ;;  %s1305_s1 = inlined_call_operand.vmem [shape: s32[32,1], index: 1, kind: input, shape index: {}]   ;;  %s1306_s2 = inlined_call_operand.hbm [shape: f32[2,4,256], index: 2, kind: output, shape index: {0}]   ;;  %s1307_s3 = inlined_call_operand.hbm [shape: f32[2,4,256], index: 3, kind: output, shape index: {1}]   ;;  %s1308_s4 = inlined_call_operand.hbm [shape: f32[2,1,4], index: 4, kind: output, shape index: {2}]  }
   0x1   :  { %1314 = sst [smem:[#allocation17_spill]] %s1304_s0 }
   0x2   :  { %1315 = sst [smem:[#allocation18_spill]] %s1305_s1 }
   0x3   :  { %10 = vsyncpa [#allocation3], 0 }
   0x4   :  { %12 = vsyncpa [#allocation3 + $0x1], 0 }
   0x5   :  { %13 = vsyncpa [#allocation4], 0 }
   0x6   :  { %15 = vsyncpa [#allocation4 + $0x1], 0 }
   0x7   :  { %16 = vsyncpa [#allocation7], 0 }
   0x8   :  { %18 = vsyncpa [#allocation7 + $0x1], 0  ;;  %s1058_s15 = smov 0   ;;  %s1060_s16 = smov 0  }
   0x9   :  { %s1062_s17 = smov 0   ;;  %s1064_s18 = smov 0  }
   0xa   :  { %s1066_s19 = smov 0   ;;  %s1068_s20 = smov 0  }
   0xb   :  { %s1070_s21 = smov 0   ;;  %s1072_s22 = smov 0  }
   0xc   :  { %s1074_s23 = smov 0   ;;  %s1076_s24 = smov 0  }
   0xd   :  { %s1078_s25 = smov 0  }
   0xe LB: > { %1316 = sst [smem:[#allocation12_spill]] %s1020_s23  ;;  %s1112_s26 = sadd.s32 4294967295, %s1028_s25   ;;  %s1028_s25 = sphi %s1078_s25, %s24_s25   ;;  %s1024_s24 = sphi %s1076_s24, %s1332_s24   ;;  %s1020_s23 = sphi %s1074_s23, %s1331_s23   ;;  %s1016_s22 = sphi %s1072_s22, %s1330_s22   ;;  %s1012_s21 = sphi %s1070_s21, %s1329_s21   ;;  %s1008_s20 = sphi %s1068_s20, %s1338_s20   ;;  %s1004_s19 = sphi %s1066_s19, %s1337_s19   ;;  %s1000_s18 = sphi %s1064_s18, %s1336_s18   ;;  %s996_s17 = sphi %s1062_s17, %s1335_s17   ;;  %s992_s16 = sphi %s1060_s16, %s1334_s16   ;;  %s988_s15 = sphi %s1058_s15, %s1333_s15  }
   0xf   : > { %1317 = sst [smem:[#allocation13_spill]] %s1024_s24  ;;  %s1313_s27 = sadd.s32 4294967294, %s1028_s25  }
  0x10   : > { %s33_s28 = sadd.s32 1, %s1020_s23  ;;  %s36_s29 = sadd.s32 1, %s1024_s24 }
  0x11   : > { %p34_p0 = scmp.ge.s32.totalorder %s33_s28, 2  ;;  %s665_s30 = sshll.u32 %s1024_s24, 1 }
  0x12   : > { %s1119_s5 = sadd.s32 %s1020_s23, %s665_s30  ;;  %s47_s6 = sadd.s32 1, %s1008_s20 }
  0x13   : > { %s1340_s28 = smov (%p34_p0, %s33_s28), 0  ;;  %s1342_s29 = smov (!%p34_p0, %s36_s29), %s1024_s24 }
  0x14   : > { %1318 = sst [smem:[#allocation14_spill]] %s1340_s28  ;;  %p54_p1 = scmp.ne.s32.totalorder %s1008_s20, %s1004_s19 }
  0x15   : > { %p55_p2 = scmp.eq.s32.totalorder %s1028_s25, 0  ;;  %p38_p3 = scmp.ge.s32.totalorder %s1342_s29, 2 }
  0x16   : > { %p60_p4 = scmp.ne.s32.totalorder %s1004_s19, %s1000_s18  ;;  %p61_p6 = scmp.eq.s32.totalorder %s1112_s26, 0 }
  0x17   : > { %p1129_p5 = por %p55_p2, %p54_p1  ;;  %s1344_s29 = smov (%p38_p3, %s1342_s29), 0 }
  0x18   : > { %1320 = sst [smem:[#allocation15_spill]] %s1344_s29  ;;  %p1136_p7 = por %p61_p6, %p60_p4 }
  0x19   : > { %s103_s9 = sadd.s32 1, %s996_s17  ;;  %s666_s10 = sshll.u32 %s1344_s29, 1 }
  0x1a   : > { %s100_s11 = ssub.s32 %s1024_s24, %s1344_s29  ;;  %s43_s12 = sadd.s32 %s666_s10, %s1340_s28 }
  0x1b   : > { %p101_p8 = scmp.eq.s32.totalorder %s100_s11, 0  ;;  %s44_s13 = ssub.s32 %s1119_s5, %s43_s12 }
  0x1c   : > { %p113_p9 = scmp.ne.s32.totalorder %s996_s17, %s992_s16  ;;  %p45_p10 = scmp.eq.s32.totalorder %s44_s13, 0 }
  0x1d   : > { %p114_p11 = scmp.eq.s32.totalorder %s1112_s26, 3  ;;  %p119_p13 = scmp.ne.s32.totalorder %s992_s16, %s988_s15 }
  0x1e   : > { %s1150_s14 = scalar_select %p101_p8, %s996_s17, %s103_s9  }
  0x1f   : > { %s1153_s18 = scalar_select %p45_p10, %s1008_s20, %s47_s6  }
  0x20   : > { %p1155_p12 = por %p114_p11, %p113_p9  ;;  %p120_p0 = scmp.eq.s32.totalorder %s1313_s27, 3 }
  0x21   : > { %1322 = sst [smem:[#allocation16_spill]] %s1153_s18  ;;  %p722_p1 = scmp.lt.s32.totalorder %s1028_s25, 4 }
  0x22   : > { %s192_s10 = sand.u32 1, %s1008_s20   ;;  %p1165_p2 = por %p120_p0, %p119_p13 }
  0x23   : > { %s671_s9 = sshll.u32 %s192_s10, 4  ;;  %s697_s12 = sshll.u32 %s1119_s5, 4 }
  0x24   : > { %s1325_s0 = sld [smem:[#allocation17_spill]]  ;;  %s196_s24 = scalar_lea.vmem [#allocation2], %s671_s9 }
  0x25   : > { %s207_s23 = sshll.u32 %s196_s24, 4  ;;  %p709_p3 = pnand %p722_p1, %p1129_p5  ;;  %s208_s23 = int_to_ptr.vmem [resolvable:$true] %s207_s23 }
  0x26   : > { %p675_p4 = scmp.ge.s32.totalorder %s1028_s25, 1  ;;  %p223_p6 = scmp.lt.s32.totalorder %s1028_s25, 5 }
  0x27   : > { %s193_s27 = scalar_lea.sflag [#allocation3], %s192_s10 }
  0x28   : > { %p224_p8 = pnand %p675_p4, %p223_p6 }
  0x29   : > { %s229_s5 = sand.u32 (!%p224_p8), 1, %s1004_s19  }
  0x2a   : > { %s203_s29 = scalar_lea.hbm %s1325_s0, %s697_s12  ;;  %227 = sbr.rel (%p224_p8) target bundleno = 537 (0x219), region = 28 }
  0x2b   : > { %s205_s28 = sshll.u32 %s203_s29, 4  ;;  %s1178_s18 = sshll.u32 (!%p224_p8), %s229_s5, 4  ;;  %s206_s28 = int_to_ptr.hbm [resolvable:$true] %s205_s28 }
  0x2c   : > { %711 = dma.hbm_to_vmem [thread:$0]  (!%p709_p3), %s206_s28, 256, %s208_s23, %s193_s27  }
  0x2d   : > { %s230_s12 = scalar_lea.sflag (!%p224_p8), [#allocation3], %s229_s5  ;;  %s233_s29 = scalar_lea.vmem (!%p224_p8), [#allocation2], %s1178_s18 }
  0x2f   : > { %975 = dma.done.wait (%p1136_p7), %s230_s12, 256  }
  0x30   : > { %977 = vsyncadd (%p1136_p7), %s230_s12, 4294967040  ;;  %s1186_s24 = sand.u32 1, %s992_s16   ;;  %s679_s23 = sshll.u32 %s1016_s22, 1 }
  0x31   : > { %s677_s27 = sshll.u32 %s1186_s24, 3  ;;  %s277_s28 = sadd.s32 %s1012_s21, %s679_s23 }
  0x32   : > { %p278_p5 = scmp.lt.s32.totalorder %s277_s28, 3  ;;  %s1326_s1 = sld [smem:[#allocation18_spill]] }
  0x33   : > { %s1194_s5 = scalar_lea.vmem [#allocation5], %s677_s27  ;;  %s1196_s8 = scalar_lea.vmem [#allocation6], %s677_s27 }
  0x34   : > { %s279_s7 = scalar_select %p278_p5, %s277_s28, 3 }
  0x35   : > { %s1199_s12 = scalar_lea.vmem [#allocation8], %s1186_s24  ;;  %p682_p7 = scmp.ne.s32.totalorder %s1012_s21, 0 }
  0x36   : > { %s680_s10 = sshll.u32 %s279_s7, 3 }
  0x37   : > { %289 = sbr.rel (%p682_p7) target bundleno = 64 (0x40), region = 36 }
  0x38   : > { %s281_s6 = scalar_lea.vmem %s1326_s1, %s680_s10 }
  0x3c   : > { %vm292_vm0 = vcmask 24576   ;;  %v1030_v0 = vmov 0.0  }
  0x3d   : > { %290 = vst [vmem:[%s1194_s5] sm:$0xff] %v1030_v0 }
  0x3e   : > { %291 = vst [vmem:[%s1196_s8] sm:$0xff] %v1030_v0 }
  0x3f   : > { %293 = vst.msk [vmem:[%s1199_s12] sm:$0x1] %vm292_vm0, %v1030_v0 }
  0x40 PF: > { %v294_v1 = vlaneseq  ;;  %p683_p9 = scmp.ge.s32.totalorder %s277_s28, 4 }
  0x42   : > { %v295_v2 = vand.u32 127, %v294_v1  ;;  %299 = sbr.rel (%p683_p9) target bundleno = 494 (0x1ee), region = 40 }
  0x47   : > { %v302_v3 = vld [vmem:[%s281_s6] sm:$0xff]  ;;  %v1031_v4 = vmov 0   ;;  %vm445_vm1 = vcmask 31744   ;;  %v1032_v6 = vmov 0.0   ;;  %vm454_vm3 = vcmask 24576   ;;  %v301_v18 = vld [vmem:[%s233_s29 + $0x8] sm:$0xff] }
  0x48   : > { %815 = vset.pattern.permute.xlu0 %v1031_v4  ;;  %v444_v14 = vld [vmem:[%s1199_s12] sm:$0x1]  ;;  %381 = vmatpush.msra.mxu1 %v301_v18  ;;  %v396_v20 = vmul.f32 %v301_v18, %v301_v18  ;;  %vm342_vm4 = vcmask 64512   ;;  %vm389_vm5 = vcmask 1043456   ;;  %v394_v29 = vld [vmem:[%s1196_s8] sm:$0xff] }
  0x49   : > { %304 = vperm.xlu0 %815, %v302_v3   ;;  %v300_v17 = vld [vmem:[%s233_s29] sm:$0xff] }
  0x4a   : > { %361 = vmatpush.msra.mxu0 %v300_v17  ;;  %v395_v19 = vmul.f32 %v300_v17, %v300_v17  ;;  %432 = vmatpush.msra.mxu3 %v396_v20  ;;  %v309_v23 = vld [vmem:[%s1194_s5] sm:$0xff] }
  0x4c   : > { %412 = vmatpush.msra.mxu2 %v395_v19 }
  0xbb   : > { %v305_v5 = vpop.permute.xlu0 %304 }
  0xbc   : > { %vm306_vm2 = vcmp.eq.s32.totalorder %v305_v5, %v295_v2 }
  0xbd   : > { %v684_v7 = vsel %vm306_vm2, 1.0, %v1032_v6 }
  0xbe   : > { %v446_v8 = vsel %vm445_vm1, %v684_v7, 0.0  ;;  %310 = vxpose.xlu0.b32.start.end [1/1] (short) (narrow) %v684_v7, 8 }
  0xbf   : > { %v447_v9 = vrot.slane %v446_v8, 4 }
  0xc1   : > { %v448_v10 = vadd.f32 %v447_v9, %v446_v8 }
  0xc3   : > { %v449_v11 = vrot.slane %v448_v10, 2 }
  0xc5   : > { %v450_v12 = vadd.f32 %v449_v11, %v448_v10 }
  0xc7   : > { %v451_v13 = vrot.slane %v450_v12, 1 }
  0xc9   : > { %v452_v15 = vadd.f32 %v451_v13, %v450_v12 }
  0xcb   : > { %v453_v16 = vadd.f32 %v452_v15, %v444_v14 }
  0xcd   : > { %455 = vst.msk [vmem:[%s1199_s12] sm:$0x1] %vm454_vm3, %v453_v16 }
 0x162   : > { %v326_v21 = vpop.trf.xlu0 }
 0x163   : > { %685 = vmatmul.msk.f32.vlgmr.msra.gmra.mxu0 %vm342_vm4, %v326_v21  ;;  %686 = vmatmul.msk.f32.vlgmr.msra.gmra.mxu1 %vm342_vm4, %v326_v21 }
 0x164   : > { %687 = vmatmul.msk.f32.vlgmr.msra.gmra.mxu2 %vm342_vm4, %v326_v21  ;;  %688 = vmatmul.msk.f32.vlgmr.msra.gmra.mxu3 %vm342_vm4, %v326_v21 }
 0x1e0   : > { %v383_v22 = vpop.f32.mrf.mxu1  ;;  %v363_v25 = vpop.f32.mrf.mxu0 }
 0x1e1   : > { %v388_v24 = vrot.slane %v383_v22, 4 }
 0x1e3   : > { %v390_v26 = vsel %vm389_vm5, %v363_v25, %v388_v24 }
 0x1e4   : > { %v392_v27 = vadd.f32 %v390_v26, %v309_v23 }
 0x1e6   : > { %393 = vst [vmem:[%s1194_s5] sm:$0xff] %v392_v27 }
 0x1e7   : > { %v434_v28 = vpop.f32.mrf.mxu3  ;;  %v414_v31 = vpop.f32.mrf.mxu2 }
 0x1e8   : > { %v439_v30 = vrot.slane %v434_v28, 4 }
 0x1ea   : > { %v440_v32 = vsel %vm389_vm5, %v414_v31, %v439_v30 }
 0x1eb   : > { %v442_v33 = vadd.f32 %v440_v32, %v394_v29 }
 0x1ed   : > { %443 = vst [vmem:[%s1196_s8] sm:$0xff] %v442_v33 }
 0x1ee PF: > { %s461_s21 = sand.u32 1, %s1112_s26   ;;  %s698_s18 = sshll.u32 %s1016_s22, 3 }
 0x1ef   : > { %s492_s27 = scalar_lea.hbm %s1307_s3, %s698_s18  ;;  %s494_s28 = sshll.u32 %s1196_s8, 4  ;;  %s495_s28 = int_to_ptr.vmem [resolvable:$true] %s494_s28 }
 0x1f0   : > { %s496_s7 = sshll.u32 %s492_s27, 4  ;;  %s1221_s10 = scalar_lea.sflag [#allocation7], %s461_s21  ;;  %s497_s7 = int_to_ptr.hbm [resolvable:$true] %s496_s7 }
 0x1f1   : > { %s860_s9 = sshra.s32 %s497_s7, 4  ;;  %s866_s0 = scalar_lea.hbm %s1307_s3, 16  ;;  %s861_s9 = int_to_ptr.hbm [resolvable:$true] %s860_s9 }
 0x1f2   : > { %s862_s13 = scalar_lea.hbm %s861_s9, 8  ;;  %p867_p0 = scmp.lt.s32.totalorder %s861_s9, %s1307_s3 }
 0x1f3   : > { %p863_p10 = scmp.ne.s32.totalorder %s861_s9, %s862_s13  ;;  %p868_p1 = scmp.lt.s32.totalorder %s866_s0, %s862_s13 }
 0x1f5   : > { %p864_p11 = pnand %p863_p10, %p1155_p12  ;;  %p869_p3 = por %p868_p1, %p867_p0 }
 0x1f7   : > { %p865_p13 = pneg %p864_p11 }
 0x1f9   : > { %p870_p4 = pnand %p869_p3, %p865_p13 }
 0x1fb   : > { %873 = shalt.err (!%p870_p4)
}
 0x1fc   : > { %703 = dma.vmem_to_hbm [thread:$0]  (%p1155_p12), %s495_s28, 128, %s497_s7, %s1221_s10  }
 0x1fd   : > { %s477_s23 = scalar_lea.hbm %s1306_s2, %s698_s18  ;;  %s479_s27 = sshll.u32 %s1194_s5, 4  ;;  %s480_s27 = int_to_ptr.vmem [resolvable:$true] %s479_s27 }
 0x1fe   : > { %s481_s6 = sshll.u32 %s477_s23, 4  ;;  %s457_s1 = scalar_lea.sflag [#allocation4], %s1186_s24  ;;  %s482_s6 = int_to_ptr.hbm [resolvable:$true] %s481_s6 }
 0x1ff   : > { %s888_s0 = sshra.s32 %s482_s6, 4  ;;  %s894_s28 = scalar_lea.hbm %s1306_s2, 16  ;;  %s889_s0 = int_to_ptr.hbm [resolvable:$true] %s888_s0 }
 0x200   : > { %s890_s9 = scalar_lea.hbm %s889_s0, 8  ;;  %p895_p7 = scmp.lt.s32.totalorder %s889_s0, %s1306_s2 }
 0x201   : > { %p891_p6 = scmp.ne.s32.totalorder %s889_s0, %s890_s9  ;;  %p896_p9 = scmp.lt.s32.totalorder %s894_s28, %s890_s9 }
 0x203   : > { %p892_p8 = pnand %p891_p6, %p1155_p12  ;;  %p897_p10 = por %p896_p9, %p895_p7 }
 0x205   : > { %p893_p5 = pneg %p892_p8 }
 0x207   : > { %p898_p11 = pnand %p897_p10, %p893_p5 }
 0x209   : > { %901 = shalt.err (!%p898_p11)
}
 0x20a   : > { %702 = dma.vmem_to_hbm [thread:$0]  (%p1155_p12), %s480_s27, 128, %s482_s6, %s457_s1  }
 0x20b   : > { %s505_s18 = scalar_lea.hbm %s1308_s4, %s1016_s22  ;;  %s507_s8 = sshll.u32 %s1199_s12, 4  ;;  %s508_s8 = int_to_ptr.vmem [resolvable:$true] %s507_s8 }
 0x20c   : > { %s509_s21 = sshll.u32 %s505_s18, 4  ;;  %s922_s26 = scalar_lea.hbm %s1308_s4, 2  ;;  %s510_s21 = int_to_ptr.hbm [resolvable:$true] %s509_s21 }
 0x20d   : > { %s916_s23 = sshra.s32 %s510_s21, 4  ;;  %s917_s23 = int_to_ptr.hbm [resolvable:$true] %s916_s23 }
 0x20e   : > { %s918_s0 = scalar_lea.hbm %s917_s23, 1  ;;  %p923_p3 = scmp.lt.s32.totalorder %s917_s23, %s1308_s4 }
 0x20f   : > { %p919_p13 = scmp.ne.s32.totalorder %s917_s23, %s918_s0  ;;  %p924_p4 = scmp.lt.s32.totalorder %s922_s26, %s918_s0 }
 0x211   : > { %p920_p0 = pnand %p919_p13, %p1155_p12  ;;  %p925_p6 = por %p924_p4, %p923_p3 }
 0x213   : > { %p921_p1 = pneg %p920_p0 }
 0x215   : > { %p926_p8 = pnand %p925_p6, %p921_p1 }
 0x217   : > { %929 = shalt.err (!%p926_p8)
}
 0x218   : > { %704 = dma.vmem_to_hbm [thread:$0]  (%p1155_p12), %s508_s8, 16, %s510_s21, %s1221_s10  }
 0x219 PF: > { %p723_p5 = scmp.ge.s32.totalorder %s1028_s25, 2  ;;  %s521_s22 = sand.u32 1, %s988_s15  }
 0x21a   : > { %s522_s12 = scalar_lea.sflag [#allocation4], %s521_s22 }
 0x21b   : > { %p713_p7 = pnand %p723_p5, %p1165_p2 }
 0x21d   : > { %p714_p9 = pneg %p713_p7 }
 0x21f   : > { %979 = dma.done.wait (%p714_p9), %s522_s12, 128  }
 0x220   : > { %981 = vsyncadd (%p714_p9), %s522_s12, 4294967168  ;;  %s1327_s1 = sadd.s32 4294967294, %s1028_s25  }
 0x221   : > { %s531_s28 = sand.u32 1, %s1327_s1  }
 0x222   : > { %s532_s7 = scalar_lea.sflag [#allocation7], %s531_s28 }
 0x223   : > { %983 = dma.done.wait (%p714_p9), %s532_s7, 144  }
 0x224   : > { %985 = vsyncadd (%p714_p9), %s532_s7, 4294967152  ;;  %s24_s25 = sadd.s32 1, %s1028_s25   ;;  %s1328_s30 = sld [smem:[#allocation16_spill]] }
 0x225   : > { %p21_p12 = scmp.ge.s32.totalorder %s24_s25, 6   ;;  %s1329_s21 = sld [smem:[#allocation12_spill]] }
 0x226   : > { %s1330_s22 = sld [smem:[#allocation13_spill]]  ;;  %s1333_s15 = smov %s992_s16 }
 0x227   : > { %s1331_s23 = sld [smem:[#allocation14_spill]]  ;;  %s1334_s16 = smov %s996_s17 }
 0x228   : > { %s1332_s24 = sld [smem:[#allocation15_spill]]  ;;  %s1335_s17 = smov %s1150_s14 }
 0x229   : > { %s1336_s18 = smov %s1004_s19  ;;  %s1337_s19 = smov %s1008_s20 }
 0x22a   : > { %s1338_s20 = smov %s1328_s30  ;;  %23 = sbr.rel (!%p21_p12) target bundleno = 14 (0xe), region = 116 }
 0x22f   :  { %547 = vsyncpa [#allocation3], 1 }
 0x230   :  { %549 = vsyncpa [#allocation3 + $0x1], 1 }
 0x231   :  { %550 = vsyncpa [#allocation4], 1 }
 0x232   :  { %552 = vsyncpa [#allocation4 + $0x1], 1 }
 0x233   :  { %553 = vsyncpa [#allocation7], 1 }
 0x234   :  { %555 = vsyncpa [#allocation7 + $0x1], 1 }

</bundles_post_ra>
